<compile_context>
chip_gen: v7x
topology: tpu7x:2x2x1
jax: 0.10.0
libtpu: 0.0.40
codegen_flags: <defaults>
</compile_context>

<pallas_src>
import functools

import jax
import jax.numpy as jnp
from jax.experimental import pallas as pl
from jax.experimental.pallas import tpu as pltpu

GAMMA = 1.5
ALPHA = 0.25
# ~2 MB per input block: 2 inputs x 2 buffers x 2 MB fits every generation's
# default scoped VMEM (v5e 16 MiB, v6e/v7x 32 MiB).
_TARGET_BLOCK_BYTES = 2 * 1024 * 1024


def _qfocal_loss_kernel(pred_ref, true_ref, out_ref, *,
                        gamma, alpha, rows, cols, tile_rows, acc_rows,
                        steps_per_shard, ragged, approx_reciprocal):
    p = pl.program_id(0)   # partial-sum shard ('parallel' -> sharded on 2-TC chips)
    j = pl.program_id(1)   # sequential reduction step within the shard

    @pl.when(j == 0)
    def _():
        out_ref[...] = jnp.zeros_like(out_ref)

    x = pred_ref[...].astype(jnp.float32)
    y = true_ref[...].astype(jnp.float32)

    # BCEWithLogitsLoss (reduction='none'), numerically stable form.
    # e = exp(-|x|) is reused below to rebuild the sigmoid (saves an exp).
    e = jnp.exp(-jnp.abs(x))
    bce = jnp.maximum(x, 0.0) - x * y + jnp.log1p(e)

    # sigmoid(x) from e:  x>=0 -> 1/(1+e);  x<0 -> e/(1+e)
    if approx_reciprocal:
        r = pl.reciprocal(1.0 + e, approx=True)   # EUP vrcp: off the VALU slot
    else:
        r = 1.0 / (1.0 + e)
    pred_prob = jnp.where(x >= 0.0, r, e * r)

    alpha_factor = y * alpha + (1.0 - y) * (1.0 - alpha)
    t = jnp.abs(y - pred_prob)
    if gamma == 1.5:
        modulating_factor = t * jnp.sqrt(t)        # t**1.5 without exp/log
    elif gamma == 2.0:
        modulating_factor = t * t
    elif gamma == 1.0:
        modulating_factor = t
    else:
        modulating_factor = t ** gamma             # generic fallback

    loss = bce * alpha_factor * modulating_factor

    def accumulate(vals):
        # Lane-dense partial accumulation into the resident output block
        # (sum over the leading axis is pure VPU vreg adds; no XLU in the loop).
        part = vals.reshape(tile_rows // acc_rows, acc_rows, cols).sum(axis=0)
        out_ref[...] += part[None, :, :]

    if ragged:
        # Only the final (partial or grid-overflow) block pays the mask cost.
        block_row0 = (p * steps_per_shard + j) * tile_rows
        needs_mask = block_row0 + tile_rows > rows

        @pl.when(jnp.logical_not(needs_mask))
        def _():
            accumulate(loss)

        @pl.when(needs_mask)
        def _():
            row_ids = block_row0 + jax.lax.broadcasted_iota(
                jnp.int32, (tile_rows, 1), 0)
            accumulate(jnp.where(row_ids < rows, loss, 0.0))
    else:
        accumulate(loss)


def _choose_cols(total, hw):
    """Copy-free (rows, cols) factorization with a lane-dense, bounded cols."""
    best = None
    for cols in range(2048, 127, -128):            # multiples of 128, large->small
        if total % cols == 0:
            if total // cols >= 8:                 # prefer >= 8 sublane rows
                return cols
            if best is None:
                best = cols
    if best is not None:
        return best
    # TODO(synk): if total is not divisible by 128 AND H*W is very large, this
    # fallback block can exceed the ~2 MB target (would need a pad-copy or a
    # column-tiled variant); realistic detection shapes never hit this.
    return hw                                      # original (B*C, H*W) split


def qfocal_loss(pred, true, gamma=GAMMA, alpha=ALPHA, *,
                input_dtype=None, approx_reciprocal=True):
    """pred, true: (B, C, H, W). Returns the scalar mean QFocal loss (f32)."""
    # TODO(synk): only the 'mean' reduction of the wrapped BCEWithLogitsLoss is
    # implemented (the standard YOLO configuration); 'sum'/'none' not exposed.
    assert pred.shape == true.shape
    B, C, H, W = pred.shape
    total = B * C * H * W

    if input_dtype is not None:
        # Explicit opt-in (e.g. jnp.bfloat16): halves HBM traffic on mem-bound
        # v5e/v6e; kernel math stays f32 in-register.
        pred = pred.astype(input_dtype)
        true = true.astype(input_dtype)

    cols = _choose_cols(total, H * W)
    rows = total // cols
    pred2d = pred.reshape(rows, cols)              # order-preserving -> copy-free
    true2d = true.reshape(rows, cols)

    itemsize = pred2d.dtype.itemsize
    tile_rows = _TARGET_BLOCK_BYTES // (cols * itemsize)
    tile_rows = max(8, (tile_rows // 8) * 8)
    if tile_rows >= rows:
        tile_rows = rows
    n_blocks = pl.cdiv(rows, tile_rows)

    # Always split into two partial-sum shards when there are >= 2 blocks so a
    # 'parallel' leading axis can be sharded across TensorCores on multi-core
    # chips.  At most one overflow step exists; it re-maps to the last block
    # (Pallas elides the re-DMA for an unchanged block index) and its
    # contribution is masked to zero in-kernel.
    n_par = 2 if n_blocks >= 2 else 1
    steps_per_shard = pl.cdiv(n_blocks, n_par)
    grid_overflow = n_par * steps_per_shard != n_blocks
    ragged = grid_overflow or (rows % tile_rows != 0)
    acc_rows = 8 if tile_rows % 8 == 0 else tile_rows
    last_block = n_blocks - 1

    def in_map(p, j):
        b = p * steps_per_shard + j
        if grid_overflow:
            b = jnp.minimum(b, last_block)
        return (b, 0)

    kernel = functools.partial(
        _qfocal_loss_kernel, gamma=gamma, alpha=alpha, rows=rows, cols=cols,
        tile_rows=tile_rows, acc_rows=acc_rows,
        steps_per_shard=steps_per_shard, ragged=ragged,
        approx_reciprocal=approx_reciprocal)

    partials = pl.pallas_call(
        kernel,
        out_shape=jax.ShapeDtypeStruct((n_par, acc_rows, cols), jnp.float32),
        grid_spec=pltpu.PrefetchScalarGridSpec(
            num_scalar_prefetch=0,
            grid=(n_par, steps_per_shard),
            in_specs=[
                pl.BlockSpec((tile_rows, cols), in_map),
                pl.BlockSpec((tile_rows, cols), in_map),
            ],
            out_specs=pl.BlockSpec((1, acc_rows, cols),
                                   lambda p, j: (p, 0, 0)),
        ),
        compiler_params=pltpu.CompilerParams(
            dimension_semantics=("parallel", "arbitrary")),
    )(pred2d, true2d)

    # Tiny final reduce + mean (kept out of the kernel's steady-state loop).
    return jnp.sum(partials) * jnp.float32(1.0 / total)


def _qfocal_loss_ref(pred, true, gamma=GAMMA, alpha=ALPHA):
    x = pred.astype(jnp.float32)
    y = true.astype(jnp.float32)
    bce = jnp.maximum(x, 0.0) - x * y + jnp.log1p(jnp.exp(-jnp.abs(x)))
    p = jax.nn.sigmoid(x)
    alpha_factor = y * alpha + (1.0 - y) * (1.0 - alpha)
    modulating_factor = jnp.abs(y - p) ** gamma
    return jnp.mean(bce * alpha_factor * modulating_factor)


if __name__ == "__main__":
    key = jax.random.PRNGKey(0)
    k1, k2 = jax.random.split(key)
    B, C, H, W = 2, 4, 16, 16
    pred = jax.random.normal(k1, (B, C, H, W), dtype=jnp.float32) * 2.0
    # Quality-focal targets can be soft; use values in [0, 1].
    true = jax.random.uniform(k2, (B, C, H, W), dtype=jnp.float32)

    ref = _qfocal_loss_ref(pred, true)

    # Exact-reciprocal path: tight check of the kernel math.
    out_exact = jax.block_until_ready(
        qfocal_loss(pred, true, approx_reciprocal=False))
    assert jnp.allclose(out_exact, ref, rtol=1e-5, atol=1e-6), (out_exact, ref)

    # Default path (approx EUP reciprocal): slightly looser tolerance.
    out = jax.block_until_ready(qfocal_loss(pred, true))
    assert jnp.allclose(out, ref, rtol=5e-3, atol=1e-4), (out, ref)

    # Opt-in bf16-input path (bandwidth win on v5e/v6e).
    out_bf16 = jax.block_until_ready(
        qfocal_loss(pred, true, input_dtype=jnp.bfloat16))
    assert jnp.allclose(out_bf16, ref, rtol=5e-2, atol=1e-3), (out_bf16, ref)

    print("KERNEL_OK")
</pallas_src>

<mosaic_0001>
module attributes {stable_mosaic.version = 11 : i64} {
  func.func @_qfocal_loss_kernel(%arg0: i32, %arg1: i32, %arg2: memref<8x256xf32, #tpu.memory_space<vmem>>, %arg3: memref<8x256xf32, #tpu.memory_space<vmem>>, %arg4: memref<1x8x256xf32, #tpu.memory_space<vmem>>) attributes {dimension_semantics = [#tpu.dimension_semantics<parallel>, #tpu.dimension_semantics<arbitrary>], iteration_bounds = array<i64: 1, 1>, scalar_prefetch = 0 : i64, scratch_operands = 0 : i64, tpu.core_type = #tpu.core_type<tc>, window_params = [{transform_indices = @transform_0, window_bounds = array<i64: 8, 256>}, {transform_indices = @transform_1, window_bounds = array<i64: 8, 256>}, {transform_indices = @transform_2, window_bounds = array<i64: 1, 8, 256>}]} {
    %c0_i32 = arith.constant 0 : i32
    %0 = arith.cmpi eq, %arg1, %c0_i32 : i32
    %1 = arith.extui %0 : i1 to i32
    %c0_i32_0 = arith.constant 0 : i32
    %2 = arith.cmpi ne, %1, %c0_i32_0 : i32
    scf.if %2 {
      %cst_18 = arith.constant 0.000000e+00 : f32
      %42 = vector.broadcast %cst_18 : f32 to vector<1x8x256xf32>
      %c0_19 = arith.constant 0 : index
      %c0_20 = arith.constant 0 : index
      %c0_21 = arith.constant 0 : index
      %43 = vector.load %arg4[%c0_19, %c0_20, %c0_21] : memref<1x8x256xf32, #tpu.memory_space<vmem>>, vector<1x8x256xf32>
      tpu.vector_store %arg4[%c0_19, %c0_20, %c0_21], %42 {strides = array<i32>} : memref<1x8x256xf32, #tpu.memory_space<vmem>>, vector<1x8x256xf32>,
    } else {
    }
    %c0 = arith.constant 0 : index
    %c0_1 = arith.constant 0 : index
    %3 = vector.load %arg2[%c0, %c0_1] : memref<8x256xf32, #tpu.memory_space<vmem>>, vector<8x256xf32>
    %c0_2 = arith.constant 0 : index
    %c0_3 = arith.constant 0 : index
    %4 = vector.load %arg3[%c0_2, %c0_3] : memref<8x256xf32, #tpu.memory_space<vmem>>, vector<8x256xf32>
    %5 = math.absf %3 : vector<8x256xf32>
    %cst = arith.constant 0.000000e+00 : f32
    %6 = vector.broadcast %cst : f32 to vector<8x256xf32>
    %7 = arith.subf %6, %5 : vector<8x256xf32>
    %8 = math.exp %7 : vector<8x256xf32>
    %cst_4 = arith.constant 0.000000e+00 : f32
    %9 = vector.broadcast %cst_4 : f32 to vector<8x256xf32>
    %10 = arith.maximumf %3, %9 : vector<8x256xf32>
    %11 = arith.mulf %3, %4 : vector<8x256xf32>
    %12 = arith.subf %10, %11 : vector<8x256xf32>
    %13 = math.log1p %8 : vector<8x256xf32>
    %14 = arith.addf %12, %13 : vector<8x256xf32>
    %cst_5 = arith.constant 1.000000e+00 : f32
    %15 = vector.broadcast %cst_5 : f32 to vector<8x256xf32>
    %16 = arith.addf %15, %8 : vector<8x256xf32>
    %cst_6 = arith.constant 1.000000e+00 : f32
    %17 = vector.broadcast %cst_6 : f32 to vector<8x256xf32>
    %18 = arith.divf %17, %16 : vector<8x256xf32>
    %cst_7 = arith.constant 0.000000e+00 : f32
    %19 = vector.broadcast %cst_7 : f32 to vector<8x256xf32>
    %20 = arith.cmpf oge, %3, %19 : vector<8x256xf32>
    %21 = arith.mulf %8, %18 : vector<8x256xf32>
    %22 = arith.select %20, %18, %21 : vector<8x256xi1>, vector<8x256xf32>
    %cst_8 = arith.constant 2.500000e-01 : f32
    %23 = vector.broadcast %cst_8 : f32 to vector<8x256xf32>
    %24 = arith.mulf %4, %23 : vector<8x256xf32>
    %cst_9 = arith.constant 1.000000e+00 : f32
    %25 = vector.broadcast %cst_9 : f32 to vector<8x256xf32>
    %26 = arith.subf %25, %4 : vector<8x256xf32>
    %cst_10 = arith.constant 7.500000e-01 : f32
    %27 = vector.broadcast %cst_10 : f32 to vector<8x256xf32>
    %28 = arith.mulf %26, %27 : vector<8x256xf32>
    %29 = arith.addf %24, %28 : vector<8x256xf32>
    %30 = arith.subf %4, %22 : vector<8x256xf32>
    %31 = math.absf %30 : vector<8x256xf32>
    %32 = math.sqrt %31 : vector<8x256xf32>
    %33 = arith.mulf %31, %32 : vector<8x256xf32>
    %34 = arith.mulf %14, %29 : vector<8x256xf32>
    %35 = arith.mulf %34, %33 : vector<8x256xf32>
    %36 = vector.shape_cast %35 : vector<8x256xf32> to vector<1x8x256xf32>
    %cst_11 = arith.constant dense<0.000000e+00> : vector<8x256xf32>
    %37 = vector.multi_reduction <add>, %36, %cst_11 [0] : vector<1x8x256xf32> to vector<8x256xf32>
    %c0_12 = arith.constant 0 : index
    %c0_13 = arith.constant 0 : index
    %c0_14 = arith.constant 0 : index
    %38 = vector.load %arg4[%c0_12, %c0_13, %c0_14] : memref<1x8x256xf32, #tpu.memory_space<vmem>>, vector<1x8x256xf32>
    %39 = vector.shape_cast %37 : vector<8x256xf32> to vector<1x8x256xf32>
    %40 = arith.addf %38, %39 : vector<1x8x256xf32>
    %c0_15 = arith.constant 0 : index
    %c0_16 = arith.constant 0 : index
    %c0_17 = arith.constant 0 : index
    %41 = vector.load %arg4[%c0_15, %c0_16, %c0_17] : memref<1x8x256xf32, #tpu.memory_space<vmem>>, vector<1x8x256xf32>
    tpu.vector_store %arg4[%c0_15, %c0_16, %c0_17], %40 {strides = array<i32>} : memref<1x8x256xf32, #tpu.memory_space<vmem>>, vector<1x8x256xf32>,
    return
  }
  func.func @transform_0(%arg0: i32, %arg1: i32) -> (i32, i32) {
    %c1_i32 = arith.constant 1 : i32
    %0 = arith.muli %arg0, %c1_i32 : i32
    %1 = arith.addi %0, %arg1 : i32
    %c0_i32 = arith.constant 0 : i32
    %c0_i32_0 = arith.constant 0 : i32
    return %1, %c0_i32 : i32, i32
  }
  func.func @transform_1(%arg0: i32, %arg1: i32) -> (i32, i32) {
    %c1_i32 = arith.constant 1 : i32
    %0 = arith.muli %arg0, %c1_i32 : i32
    %1 = arith.addi %0, %arg1 : i32
    %c0_i32 = arith.constant 0 : i32
    %c0_i32_0 = arith.constant 0 : i32
    return %1, %c0_i32 : i32, i32
  }
  func.func @transform_2(%arg0: i32, %arg1: i32) -> (i32, i32, i32) {
    %c0_i32 = arith.constant 0 : i32
    %c0_i32_0 = arith.constant 0 : i32
    %c0_i32_1 = arith.constant 0 : i32
    return %arg0, %c0_i32, %c0_i32_0 : i32, i32, i32
  }
}

</mosaic_0001>

<bundles_post_ra>
// kernel: tpu_custom_call.1
= control target key start
LH: loop header
LB: loop body
LE: loop exit
PB: predicated region body
PF: predicated region fallthrough
CT: control target
= control target key end

     0   :  { %7 = vsyncpa [#allocation3], 0  ;;  %s304_s0 = inlined_call_operand.hbm [shape: f32[8,256], index: 0, kind: input, shape index: {}]   ;;  %s305_s1 = inlined_call_operand.hbm [shape: f32[8,256], index: 1, kind: input, shape index: {}]   ;;  %s306_s2 = inlined_call_operand.hbm [shape: f32[1,8,256], index: 2, kind: output, shape index: {}]  }
   0x1   :  { %8 = vsyncpa [#allocation6], 0 }
   0x2   :  { %9 = vsyncpa [#allocation4], 0  ;;  %s250_s9 = smov [#allocation2]   ;;  %s251_s11 = smov [#allocation5]  }
   0x3   :  { %s20_s10 = sshll.u32 %s250_s9, 4  ;;  %s34_s12 = sshll.u32 %s251_s11, 4  ;;  %s21_s10 = int_to_ptr.vmem [resolvable:$true] %s20_s10  ;;  %s35_s12 = int_to_ptr.vmem [resolvable:$true] %s34_s12 }
   0x4   :  { %s178_s15 = scalar_lea.hbm %s304_s0, 256 }
   0x5   :  { %p179_p0 = scmp.ne.s32.totalorder %s304_s0, %s178_s15  ;;  %p182_p1 = scmp.lt.u32.totalorder %s178_s15, %s304_s0 }
   0x7   :  { %p184_p2 = pnand %p182_p1, %p179_p0 }
   0x9   :  { %187 = shalt.err (!%p184_p2)
}
   0xa   :  { %s188_s20 = scalar_lea.vmem %s21_s10, 256  ;;  %p193_p4 = scmp.lt.s32.totalorder %s21_s10, %s21_s10 }
   0xb   :  { %p189_p3 = scmp.ne.s32.totalorder %s21_s10, %s188_s20  ;;  %p194_p5 = scmp.lt.s32.totalorder %s188_s20, %s188_s20 }
   0xd   :  { %p195_p6 = por %p194_p5, %p193_p4 }
   0xf   :  { %p196_p7 = pnand %p195_p6, %p189_p3 }
  0x11   :  { %199 = shalt.err (!%p196_p7)
}
  0x12   :  { %23 = dma.hbm_to_vmem [thread:$0]  %s304_s0, 256, %s21_s10, [#allocation3]  }
  0x13   :  { %s200_s25 = scalar_lea.hbm %s305_s1, 256 }
  0x14   :  { %p201_p8 = scmp.ne.s32.totalorder %s305_s1, %s200_s25  ;;  %p204_p9 = scmp.lt.u32.totalorder %s200_s25, %s305_s1 }
  0x16   :  { %p206_p10 = pnand %p204_p9, %p201_p8 }
  0x18   :  { %209 = shalt.err (!%p206_p10)
}
  0x19   :  { %s210_s30 = scalar_lea.vmem %s35_s12, 256  ;;  %p215_p12 = scmp.lt.s32.totalorder %s35_s12, %s35_s12 }
  0x1a   :  { %p211_p11 = scmp.ne.s32.totalorder %s35_s12, %s210_s30  ;;  %p216_p13 = scmp.lt.s32.totalorder %s210_s30, %s210_s30 }
  0x1c   :  { %p217_p0 = por %p216_p13, %p215_p12 }
  0x1e   :  { %p218_p1 = pnand %p217_p0, %p211_p11 }
  0x20   :  { %221 = shalt.err (!%p218_p1)
}
  0x21   :  { %37 = dma.hbm_to_vmem [thread:$0]  %s305_s1, 256, %s35_s12, [#allocation6]  }
  0x22   :  { %244 = dma.done.wait [#allocation3], 256  }
  0x23   :  { %245 = vsyncadd [#allocation3], 4294967040 }
  0x24   :  { %246 = dma.done.wait [#allocation6], 256  }
  0x25   :  { %247 = vsyncadd [#allocation6], 4294967040  ;;  %v52_v0 = vld [vmem:[#allocation2] sm:$0xff]  ;;  %v53_v1 = vld [vmem:[#allocation2 + $0x8] sm:$0xff]  ;;  %s252_s1 = smov [#allocation7]  }
  0x26   :  { %v56_v2 = vand.u32 2147483647, %v52_v0  ;;  %v57_v3 = vand.u32 2147483647, %v53_v1  ;;  %vm96_vm0 = vcmp.ge.f32.partialorder %v52_v0, 0.0  ;;  %v54_v13 = vld [vmem:[#allocation5] sm:$0xff] }
  0x27   :  { %vm97_vm1 = vcmp.ge.f32.partialorder %v53_v1, 0.0  ;;  %v55_v18 = vld [vmem:[#allocation5 + $0x8] sm:$0xff]  ;;  %v64_v28 = vmax.f32 %v52_v0, 0.0  ;;  %v66_v29 = vmul.f32 %v54_v13, %v52_v0  ;;  %v104_v30 = vsub.f32 1.0, %v54_v13  ;;  %s148_s4 = sshll.u32 %s252_s1, 4  ;;  %s149_s4 = int_to_ptr.vmem [resolvable:$true] %s148_s4 }
  0x28   :  { %v58_v4 = vsub.f32 0.0, %v56_v2  ;;  %v59_v5 = vsub.f32 0.0, %v57_v3  ;;  %v102_v37 = vmul.f32 0.25, %v54_v13  ;;  %v65_v38 = vmax.f32 %v53_v1, 0.0  ;;  %s222_s5 = scalar_lea.vmem %s149_s4, 256  ;;  %p227_p3 = scmp.lt.s32.totalorder %s149_s4, %s149_s4 }
  0x29   :  { %v67_v39 = vmul.f32 %v55_v18, %v53_v1  ;;  %v105_v40 = vsub.f32 1.0, %v55_v18  ;;  %v68_v41 = vsub.f32 %v64_v28, %v66_v29  ;;  %v106_v42 = vmul.f32 0.75, %v104_v30  ;;  %p223_p2 = scmp.ne.s32.totalorder %s149_s4, %s222_s5  ;;  %p228_p4 = scmp.lt.s32.totalorder %s222_s5, %s222_s5 }
  0x2a   :  { %v60_v6 = vmul.f32 1.442695, %v58_v4  ;;  %v62_v7 = vmul.f32 1.442695, %v59_v5  ;;  %v103_v47 = vmul.f32 0.25, %v55_v18 }
  0x2b   :  { %v69_v46 = vsub.f32 %v65_v38, %v67_v39  ;;  %v107_v48 = vmul.f32 0.75, %v105_v40  ;;  %v108_v50 = vadd.f32 %v106_v42, %v102_v37  ;;  %p229_p5 = por %p228_p4, %p227_p3 }
  0x2c   :  { %162 = vpow2.f32 %v60_v6 }
  0x2d   :  { %164 = vpow2.f32 %v62_v7  ;;  %v109_v56 = vadd.f32 %v107_v48, %v103_v47  ;;  %p230_p6 = pnand %p229_p5, %p223_p2 }
  0x36   :  { %v163_v8 = vpop.eup %162 }
  0x37   :  { %v165_v9 = vpop.eup %164  ;;  %v70_v10 = vadd.f32 1.0, %v163_v8  ;;  %v73_v16 = vmul.f32 -0.5, %v163_v8  ;;  %v76_v27 = vand.u32 2147483647, %v163_v8 }
  0x38   :  { %v79_v11 = vadd.f32 1.0, %v165_v9  ;;  %v82_v21 = vmul.f32 -0.5, %v165_v9  ;;  %v85_v36 = vand.u32 2147483647, %v165_v9 }
  0x39   :  { %166 = vrcp.f32 %v70_v10  ;;  %v74_v23 = vadd.f32 1.0, %v73_v16  ;;  %vm77_vm2 = vcmp.lt.f32.partialorder %v76_v27, 0.0004427343 }
  0x3a   :  { %168 = vrcp.f32 %v79_v11  ;;  %v83_v31 = vadd.f32 1.0, %v82_v21  ;;  %vm86_vm3 = vcmp.lt.f32.partialorder %v85_v36, 0.0004427343 }
  0x3b   :  { %170 = vlog2.f32 %v70_v10  ;;  %v75_v35 = vmul.f32 %v163_v8, %v74_v23 }
  0x3c   :  { %172 = vlog2.f32 %v79_v11  ;;  %v84_v44 = vmul.f32 %v165_v9, %v83_v31 }
  0x43   :  { %v167_v12 = vpop.eup %166 }
  0x44   :  { %v98_v14 = vmul.f32 %v167_v12, %v163_v8  ;;  %v169_v15 = vpop.eup %168 }
  0x45   :  { %v99_v19 = vmul.f32 %v169_v15, %v165_v9  ;;  %v171_v26 = vpop.eup %170 }
  0x46   :  { %v100_v17 = vsel %vm96_vm0, %v167_v12, %v98_v14  ;;  %v173_v33 = vpop.eup %172  ;;  %v72_v34 = vmul.f32 0.6931472, %v171_v26 }
  0x47   :  { %v110_v20 = vsub.f32 %v54_v13, %v100_v17  ;;  %v101_v22 = vsel %vm97_vm1, %v169_v15, %v99_v19  ;;  %v81_v43 = vmul.f32 0.6931472, %v173_v33 }
  0x48   :  { %v111_v25 = vsub.f32 %v55_v18, %v101_v22  ;;  %v78_v45 = vsel %vm77_vm2, %v75_v35, %v72_v34 }
  0x49   :  { %v112_v24 = vand.u32 2147483647, %v110_v20  ;;  %v88_v49 = vadd.f32 %v78_v45, %v68_v41  ;;  %v87_v51 = vsel %vm86_vm3, %v84_v44, %v81_v43 }
  0x4a   :  { %v113_v32 = vand.u32 2147483647, %v111_v25  ;;  %v89_v55 = vadd.f32 %v87_v51, %v69_v46 }
  0x4b   :  { %174 = vrsqrt.f32 %v112_v24  ;;  %vm116_vm4 = vcmp.eq.f32.partialorder %v112_v24, inf  ;;  %v119_v53 = vand.u32 2147483648, %v112_v24  ;;  %vm118_vm5 = vcmp.eq.f32.partialorder %v112_v24, 0.0 }
  0x4c   :  { %176 = vrsqrt.f32 %v113_v32  ;;  %v130_v59 = vmul.f32 %v108_v50, %v88_v49  ;;  %vm123_vm6 = vcmp.eq.f32.partialorder %v113_v32, inf  ;;  %v126_v60 = vand.u32 2147483648, %v113_v32 }
  0x4d   :  { %vm125_vm7 = vcmp.eq.f32.partialorder %v113_v32, 0.0  ;;  %v131_v1 = vmul.f32 %v109_v56, %v89_v55 }
  0x55   :  { %v175_v52 = vpop.eup %174 }
  0x56   :  { %v115_v54 = vmul.f32 %v175_v52, %v112_v24  ;;  %v177_v57 = vpop.eup %176 }
  0x57   :  { %v122_v62 = vmul.f32 %v177_v57, %v113_v32 }
  0x58   :  { %v117_v58 = vsel %vm116_vm4, %v112_v24, %v115_v54 }
  0x59   :  { %v120_v61 = vsel %vm118_vm5, %v119_v53, %v117_v58  ;;  %v124_v0 = vsel %vm123_vm6, %v113_v32, %v122_v62 }
  0x5a   :  { %v128_v63 = vmul.f32 %v120_v61, %v112_v24  ;;  %v127_v3 = vsel %vm125_vm7, %v126_v60, %v124_v0 }
  0x5b   :  { %v129_v4 = vmul.f32 %v127_v3, %v113_v32 }
  0x5c   :  { %v132_v2 = vmul.f32 %v130_v59, %v128_v63 }
  0x5d   :  { %v133_v5 = vmul.f32 %v131_v1, %v129_v4 }
  0x5e   :  { %140 = vst [vmem:[#allocation7] sm:$0xff] %v132_v2 }
  0x5f   :  { %141 = vst [vmem:[#allocation7 + $0x8] sm:$0xff] %v133_v5 }
  0x60   :  { %233 = shalt.err (!%p230_p6)
}
  0x61   :  { %s234_s8 = scalar_lea.hbm %s306_s2, 256 }
  0x62   :  { %p235_p7 = scmp.ne.s32.totalorder %s306_s2, %s234_s8  ;;  %p238_p8 = scmp.lt.u32.totalorder %s234_s8, %s306_s2 }
  0x64   :  { %p240_p9 = pnand %p238_p8, %p235_p7 }
  0x66   :  { %243 = shalt.err (!%p240_p9)
}
  0x67   :  { %151 = dma.vmem_to_hbm [thread:$0]  %s149_s4, 256, %s306_s2, [#allocation4]  }
  0x68   :  { %248 = dma.done.wait [#allocation4], 256  }
  0x69   :  { %249 = vsyncadd [#allocation4], 4294967040 }
  0x6a   :  { %155 = vsyncpa [#allocation3], 1 }
  0x6b   :  { %156 = vsyncpa [#allocation6], 1 }
  0x6c   :  { %157 = vsyncpa [#allocation4], 1 }

</bundles_post_ra>
